<compile_context>
chip_gen: v6e
topology: v6e:2x2x1
jax: 0.10.0
libtpu: 0.0.40
codegen_flags: <defaults>
</compile_context>

<pallas_src>
import math

import jax
import jax.numpy as jnp
from jax.experimental import pallas as pl
from jax.experimental.pallas import tpu as pltpu

LANE = 128      # vreg lane width
SUBLANE = 8     # vreg sublane count (32-bit)


def _round_up(x, m):
    return (x + m - 1) // m * m


def _pad2d(a, rows, cols):
    """Zero-pad a 2-D array up to (rows, cols)."""
    return jnp.pad(a, ((0, rows - a.shape[0]), (0, cols - a.shape[1])))


def encoder_kernel(x_ref, w1_ref, b1_ref, w2_ref, b2_ref, wh_ref, bh_ref, out_ref):
    """Fused MLP tile: x(TB,in) -> relu(lin1) -> relu(lin2) -> [mu | sigma | 0-pad]."""
    x = x_ref[...]                                                       # (TB, in_dim) bf16

    # linear1 + relu   (bf16 MXU, f32 accumulate; lane-dense 128-wide intermediate)
    h1 = jnp.dot(x, w1_ref[...], preferred_element_type=jnp.float32) + b1_ref[...]
    h1 = jnp.maximum(h1, 0.0).astype(jnp.bfloat16)                       # (TB, inter_pad)

    # linear2 + relu
    h2 = jnp.dot(h1, w2_ref[...], preferred_element_type=jnp.float32) + b2_ref[...]
    h2 = jnp.maximum(h2, 0.0).astype(jnp.bfloat16)                       # (TB, hidden_pad)

    # fused mu||sigma head, lane-padded to a multiple of 128 -> single unmasked vst
    out = jnp.dot(h2, wh_ref[...], preferred_element_type=jnp.float32) + bh_ref[...]
    out_ref[...] = out.astype(out_ref.dtype)                             # (TB, head_pad)


def encoder_forward(x, params, *, batch_tile=256):
    """x: (B, S, F) float32. Returns (mu, sigma), each (B, latent_size) float32."""
    B = x.shape[0]
    in_dim = params["w1"].shape[0]
    inter = params["w1"].shape[1]
    hidden = params["w2"].shape[1]
    latent = params["wmu"].shape[1]

    inter_pad = _round_up(inter, LANE)
    hidden_pad = _round_up(hidden, LANE)
    head_pad = _round_up(2 * latent, LANE)              # packed [mu | sigma | zeros]

    # --- flatten + pad batch to a sublane-friendly tile --------------------
    x2d = x.reshape(B, in_dim)                          # torch .view(-1, S*F)
    tb = _round_up(min(batch_tile, _round_up(B, SUBLANE)), SUBLANE)
    b_pad = _round_up(max(B, tb), tb)
    if b_pad != B:
        x2d = jnp.pad(x2d, ((0, b_pad - B), (0, 0)))
    x_bf = x2d.astype(jnp.bfloat16)

    # --- bf16 weights; zero-pad internal dims to lane width ----------------
    # Zero padding keeps the math exact: padded activation lanes are
    # relu(0 + 0-bias) = 0 and multiply only against zero weight rows.
    w1 = _pad2d(params["w1"], in_dim, inter_pad).astype(jnp.bfloat16)
    b1 = _pad2d(params["b1"], 1, inter_pad)                              # f32
    w2 = _pad2d(params["w2"], inter_pad, hidden_pad).astype(jnp.bfloat16)
    b2 = _pad2d(params["b2"], 1, hidden_pad)                             # f32

    wh = jnp.zeros((hidden_pad, head_pad), jnp.float32)
    wh = wh.at[:hidden, :latent].set(params["wmu"])
    wh = wh.at[:hidden, latent:2 * latent].set(params["wsig"])
    wh = wh.astype(jnp.bfloat16)
    bh = jnp.zeros((1, head_pad), jnp.float32)
    bh = bh.at[:, :latent].set(params["bmu"][0])
    bh = bh.at[:, latent:2 * latent].set(params["bsig"][0])

    grid = (b_pad // tb,)

    def vspec(shape, imap):
        return pl.BlockSpec(shape, imap, memory_space=pltpu.MemorySpace.VMEM)

    flops = 2 * b_pad * (in_dim * inter_pad + inter_pad * hidden_pad
                         + hidden_pad * head_pad)
    bytes_accessed = (2 * (x_bf.size + w1.size + w2.size + wh.size)
                      + 4 * (b1.size + b2.size + bh.size)
                      + 4 * b_pad * head_pad)

    out = pl.pallas_call(
        encoder_kernel,
        out_shape=jax.ShapeDtypeStruct((b_pad, head_pad), jnp.float32),
        grid_spec=pltpu.PrefetchScalarGridSpec(
            num_scalar_prefetch=0,
            grid=grid,
            in_specs=[
                vspec((tb, in_dim), lambda i: (i, 0)),          # x tile (pipelined)
                vspec(w1.shape, lambda i: (0, 0)),              # resident weights
                vspec(b1.shape, lambda i: (0, 0)),
                vspec(w2.shape, lambda i: (0, 0)),
                vspec(b2.shape, lambda i: (0, 0)),
                vspec(wh.shape, lambda i: (0, 0)),
                vspec(bh.shape, lambda i: (0, 0)),
            ],
            out_specs=vspec((tb, head_pad), lambda i: (i, 0)),
        ),
        compiler_params=pltpu.CompilerParams(
            dimension_semantics=("parallel",)),
        cost_estimate=pl.CostEstimate(
            flops=flops, transcendentals=0, bytes_accessed=bytes_accessed),
    )(x_bf, w1, b1, w2, b2, wh, bh)

    mu = out[:B, :latent]
    sigma = out[:B, latent:2 * latent]
    return mu, sigma


def init_encoder_params(key, sequence_length, hidden_size, feature_size, latent_size):
    """Deterministic init mimicking nn.Linear default (uniform +/- 1/sqrt(fan_in)).
    Weights stored as (in_features, out_features); biases as (1, out_features)."""
    inter = hidden_size * 2
    in_dim = sequence_length * feature_size

    def linear(k, fan_in, fan_out):
        kw, kb = jax.random.split(k)
        bound = 1.0 / math.sqrt(fan_in)
        w = jax.random.uniform(kw, (fan_in, fan_out), jnp.float32, -bound, bound)
        b = jax.random.uniform(kb, (1, fan_out), jnp.float32, -bound, bound)
        return w, b

    k1, k2, k3, k4 = jax.random.split(key, 4)
    w1, b1 = linear(k1, in_dim, inter)
    w2, b2 = linear(k2, inter, hidden_size)
    wmu, bmu = linear(k3, hidden_size, latent_size)
    wsig, bsig = linear(k4, hidden_size, latent_size)
    return dict(w1=w1, b1=b1, w2=w2, b2=b2, wmu=wmu, bmu=bmu, wsig=wsig, bsig=bsig)


def encoder_reference(x, params):
    """Pure-JAX reference mirroring the kernel's bf16-input / f32-accumulate math."""
    B = x.shape[0]
    h = x.reshape(B, -1).astype(jnp.bfloat16)
    w1 = params["w1"].astype(jnp.bfloat16)
    w2 = params["w2"].astype(jnp.bfloat16)
    wmu = params["wmu"].astype(jnp.bfloat16)
    wsig = params["wsig"].astype(jnp.bfloat16)

    h1 = jnp.maximum(jnp.dot(h, w1, preferred_element_type=jnp.float32)
                     + params["b1"], 0.0).astype(jnp.bfloat16)
    h2 = jnp.maximum(jnp.dot(h1, w2, preferred_element_type=jnp.float32)
                     + params["b2"], 0.0).astype(jnp.bfloat16)
    mu = jnp.dot(h2, wmu, preferred_element_type=jnp.float32) + params["bmu"]
    sigma = jnp.dot(h2, wsig, preferred_element_type=jnp.float32) + params["bsig"]
    return mu, sigma


if __name__ == "__main__":
    # Small shapes consistent with the module: batch=2, seq=8, feature=4,
    # hidden=32 (intermediate=64), latent=16.
    batch, seq, feat, hidden, latent = 2, 8, 4, 32, 16

    key = jax.random.PRNGKey(0)
    kx, kp = jax.random.split(key)
    x = jax.random.normal(kx, (batch, seq, feat), jnp.float32)
    params = init_encoder_params(kp, seq, hidden, feat, latent)

    mu, sigma = encoder_forward(x, params)
    mu = jax.block_until_ready(mu)
    sigma = jax.block_until_ready(sigma)

    mu_ref, sigma_ref = encoder_reference(x, params)
    assert mu.shape == (batch, latent) and sigma.shape == (batch, latent)
    assert jnp.allclose(mu, mu_ref, atol=1e-3, rtol=1e-3)
    assert jnp.allclose(sigma, sigma_ref, atol=1e-3, rtol=1e-3)

    print("KERNEL_OK")
</pallas_src>

<mosaic_0001>
module attributes {stable_mosaic.version = 11 : i64} {
  func.func @encoder_kernel(%arg0: i32, %arg1: memref<8x32xbf16, #tpu.memory_space<vmem>>, %arg2: memref<32x128xbf16, #tpu.memory_space<vmem>>, %arg3: memref<1x128xf32, #tpu.memory_space<vmem>>, %arg4: memref<128x128xbf16, #tpu.memory_space<vmem>>, %arg5: memref<1x128xf32, #tpu.memory_space<vmem>>, %arg6: memref<128x128xbf16, #tpu.memory_space<vmem>>, %arg7: memref<1x128xf32, #tpu.memory_space<vmem>>, %arg8: memref<8x128xf32, #tpu.memory_space<vmem>>) attributes {dimension_semantics = [#tpu.dimension_semantics<parallel>], iteration_bounds = array<i64: 1>, scalar_prefetch = 0 : i64, scratch_operands = 0 : i64, tpu.core_type = #tpu.core_type<tc>, window_params = [{transform_indices = @transform_0, window_bounds = array<i64: 8, 32>}, {pipeline_mode = #tpu.pipeline_mode<synchronous>, transform_indices = @transform_1, window_bounds = array<i64: 32, 128>}, {pipeline_mode = #tpu.pipeline_mode<synchronous>, transform_indices = @transform_2, window_bounds = array<i64: 1, 128>}, {pipeline_mode = #tpu.pipeline_mode<synchronous>, transform_indices = @transform_3, window_bounds = array<i64: 128, 128>}, {pipeline_mode = #tpu.pipeline_mode<synchronous>, transform_indices = @transform_4, window_bounds = array<i64: 1, 128>}, {pipeline_mode = #tpu.pipeline_mode<synchronous>, transform_indices = @transform_5, window_bounds = array<i64: 128, 128>}, {pipeline_mode = #tpu.pipeline_mode<synchronous>, transform_indices = @transform_6, window_bounds = array<i64: 1, 128>}, {transform_indices = @transform_7, window_bounds = array<i64: 8, 128>}]} {
    %c0 = arith.constant 0 : index
    %c0_0 = arith.constant 0 : index
    %0 = vector.load %arg1[%c0, %c0_0] : memref<8x32xbf16, #tpu.memory_space<vmem>>, vector<8x32xbf16>
    %c0_1 = arith.constant 0 : index
    %c0_2 = arith.constant 0 : index
    %1 = vector.load %arg2[%c0_1, %c0_2] : memref<32x128xbf16, #tpu.memory_space<vmem>>, vector<32x128xbf16>
    %cst = arith.constant dense<0.000000e+00> : vector<8x128xf32>
    %2 = tpu.matmul %0, %1, %cst {dimension_numbers = #tpu.dot_dimension_numbers<[1], [0], [0], [1], [0, 0, 1, 1], [], []>} : vector<8x32xbf16>, vector<32x128xbf16>, vector<8x128xf32> -> vector<8x128xf32>
    %c0_3 = arith.constant 0 : index
    %c0_4 = arith.constant 0 : index
    %3 = vector.load %arg3[%c0_3, %c0_4] : memref<1x128xf32, #tpu.memory_space<vmem>>, vector<1x128xf32>
    %4 = vector.broadcast %3 : vector<1x128xf32> to vector<8x128xf32>
    %5 = arith.addf %2, %4 : vector<8x128xf32>
    %cst_5 = arith.constant 0.000000e+00 : f32
    %6 = vector.broadcast %cst_5 : f32 to vector<8x128xf32>
    %7 = arith.maximumf %5, %6 : vector<8x128xf32>
    %8 = arith.truncf %7 : vector<8x128xf32> to vector<8x128xbf16>
    %c0_6 = arith.constant 0 : index
    %c0_7 = arith.constant 0 : index
    %9 = vector.load %arg4[%c0_6, %c0_7] : memref<128x128xbf16, #tpu.memory_space<vmem>>, vector<128x128xbf16>
    %cst_8 = arith.constant dense<0.000000e+00> : vector<8x128xf32>
    %10 = tpu.matmul %8, %9, %cst_8 {dimension_numbers = #tpu.dot_dimension_numbers<[1], [0], [0], [1], [0, 0, 1, 1], [], []>} : vector<8x128xbf16>, vector<128x128xbf16>, vector<8x128xf32> -> vector<8x128xf32>
    %c0_9 = arith.constant 0 : index
    %c0_10 = arith.constant 0 : index
    %11 = vector.load %arg5[%c0_9, %c0_10] : memref<1x128xf32, #tpu.memory_space<vmem>>, vector<1x128xf32>
    %12 = vector.broadcast %11 : vector<1x128xf32> to vector<8x128xf32>
    %13 = arith.addf %10, %12 : vector<8x128xf32>
    %cst_11 = arith.constant 0.000000e+00 : f32
    %14 = vector.broadcast %cst_11 : f32 to vector<8x128xf32>
    %15 = arith.maximumf %13, %14 : vector<8x128xf32>
    %16 = arith.truncf %15 : vector<8x128xf32> to vector<8x128xbf16>
    %c0_12 = arith.constant 0 : index
    %c0_13 = arith.constant 0 : index
    %17 = vector.load %arg6[%c0_12, %c0_13] : memref<128x128xbf16, #tpu.memory_space<vmem>>, vector<128x128xbf16>
    %cst_14 = arith.constant dense<0.000000e+00> : vector<8x128xf32>
    %18 = tpu.matmul %16, %17, %cst_14 {dimension_numbers = #tpu.dot_dimension_numbers<[1], [0], [0], [1], [0, 0, 1, 1], [], []>} : vector<8x128xbf16>, vector<128x128xbf16>, vector<8x128xf32> -> vector<8x128xf32>
    %c0_15 = arith.constant 0 : index
    %c0_16 = arith.constant 0 : index
    %19 = vector.load %arg7[%c0_15, %c0_16] : memref<1x128xf32, #tpu.memory_space<vmem>>, vector<1x128xf32>
    %20 = vector.broadcast %19 : vector<1x128xf32> to vector<8x128xf32>
    %21 = arith.addf %18, %20 : vector<8x128xf32>
    %c0_17 = arith.constant 0 : index
    %c0_18 = arith.constant 0 : index
    %22 = vector.load %arg8[%c0_17, %c0_18] : memref<8x128xf32, #tpu.memory_space<vmem>>, vector<8x128xf32>
    tpu.vector_store %arg8[%c0_17, %c0_18], %21 {strides = array<i32>} : memref<8x128xf32, #tpu.memory_space<vmem>>, vector<8x128xf32>,
    return
  }
  func.func @transform_0(%arg0: i32) -> (i32, i32) {
    %c0_i32 = arith.constant 0 : i32
    %c0_i32_0 = arith.constant 0 : i32
    return %arg0, %c0_i32 : i32, i32
  }
  func.func @transform_1(%arg0: i32) -> (i32, i32) {
    %c0_i32 = arith.constant 0 : i32
    %c0_i32_0 = arith.constant 0 : i32
    %c0_i32_1 = arith.constant 0 : i32
    return %c0_i32, %c0_i32_0 : i32, i32
  }
  func.func @transform_2(%arg0: i32) -> (i32, i32) {
    %c0_i32 = arith.constant 0 : i32
    %c0_i32_0 = arith.constant 0 : i32
    %c0_i32_1 = arith.constant 0 : i32
    return %c0_i32, %c0_i32_0 : i32, i32
  }
  func.func @transform_3(%arg0: i32) -> (i32, i32) {
    %c0_i32 = arith.constant 0 : i32
    %c0_i32_0 = arith.constant 0 : i32
    %c0_i32_1 = arith.constant 0 : i32
    return %c0_i32, %c0_i32_0 : i32, i32
  }
  func.func @transform_4(%arg0: i32) -> (i32, i32) {
    %c0_i32 = arith.constant 0 : i32
    %c0_i32_0 = arith.constant 0 : i32
    %c0_i32_1 = arith.constant 0 : i32
    return %c0_i32, %c0_i32_0 : i32, i32
  }
  func.func @transform_5(%arg0: i32) -> (i32, i32) {
    %c0_i32 = arith.constant 0 : i32
    %c0_i32_0 = arith.constant 0 : i32
    %c0_i32_1 = arith.constant 0 : i32
    return %c0_i32, %c0_i32_0 : i32, i32
  }
  func.func @transform_6(%arg0: i32) -> (i32, i32) {
    %c0_i32 = arith.constant 0 : i32
    %c0_i32_0 = arith.constant 0 : i32
    %c0_i32_1 = arith.constant 0 : i32
    return %c0_i32, %c0_i32_0 : i32, i32
  }
  func.func @transform_7(%arg0: i32) -> (i32, i32) {
    %c0_i32 = arith.constant 0 : i32
    %c0_i32_0 = arith.constant 0 : i32
    return %arg0, %c0_i32 : i32, i32
  }
}

</mosaic_0001>

<bundles_post_ra>
// kernel: tpu_custom_call.1
= control target key start
LH: loop header
LB: loop body
LE: loop exit
PB: predicated region body
PF: predicated region fallthrough
CT: control target
= control target key end

     0   :  { %12 = vsyncpa [#allocation3], 0  ;;  %s725_s0 = inlined_call_operand.hbm [shape: bf16[8,32], index: 0, kind: input, shape index: {}]   ;;  %s726_s1 = inlined_call_operand.hbm [shape: bf16[32,128], index: 1, kind: input, shape index: {}]   ;;  %s727_s2 = inlined_call_operand.vmem [shape: f32[1,128], index: 2, kind: input, shape index: {}]   ;;  %s728_s3 = inlined_call_operand.hbm [shape: bf16[128,128], index: 3, kind: input, shape index: {}]   ;;  %s729_s4 = inlined_call_operand.vmem [shape: f32[1,128], index: 4, kind: input, shape index: {}]   ;;  %s730_s5 = inlined_call_operand.hbm [shape: bf16[128,128], index: 5, kind: input, shape index: {}]   ;;  %s731_s6 = inlined_call_operand.vmem [shape: f32[1,128], index: 6, kind: input, shape index: {}]   ;;  %s732_s7 = inlined_call_operand.hbm [shape: f32[8,128], index: 7, kind: output, shape index: {}]  }
   0x1   :  { %13 = vsyncpa [#allocation6], 0 }
   0x2   :  { %14 = vsyncpa [#allocation9], 0 }
   0x3   :  { %15 = vsyncpa [#allocation4], 0  ;;  %s619_s24 = smov [#allocation5]  }
   0x4   :  { %s31_s25 = sshll.u32 %s619_s24, 4  ;;  %s32_s25 = int_to_ptr.vmem [resolvable:$true] %s31_s25 }
   0x5   :  { %s519_s26 = scalar_lea.vmem %s32_s25, 256  ;;  %p524_p1 = scmp.lt.s32.totalorder %s32_s25, %s32_s25 }
   0x6   :  { %p520_p0 = scmp.ne.s32.totalorder %s32_s25, %s519_s26  ;;  %p525_p2 = scmp.lt.s32.totalorder %s519_s26, %s519_s26 }
   0x8   :  { %p526_p3 = por %p525_p2, %p524_p1 }
   0xa   :  { %p527_p4 = pnand %p526_p3, %p520_p0 }
   0xc   :  { %530 = shalt.err (!%p527_p4)
}
   0xd   :  { %s620_s27 = smov 64   ;;  %s621_s28 = smov 4  }
   0xe   :  { %37 = dma.hbm_to_vmem [thread:$0]  %s726_s1, 256, %s32_s25, [#allocation6], %s620_s27, %s620_s27, %s621_s28  }
   0xf   :  { %s622_s8 = smov [#allocation2]   ;;  %s623_s10 = smov [#allocation7]  }
  0x10   :  { %s22_s9 = sshll.u32 %s622_s8, 4  ;;  %s45_s11 = sshll.u32 %s623_s10, 4  ;;  %s23_s9 = int_to_ptr.vmem [resolvable:$true] %s22_s9  ;;  %s46_s11 = int_to_ptr.vmem [resolvable:$true] %s45_s11 }
  0x11   :  { %s539_s12 = scalar_lea.vmem %s23_s9, 64  ;;  %p544_p6 = scmp.lt.s32.totalorder %s23_s9, %s23_s9 }
  0x12   :  { %p540_p5 = scmp.ne.s32.totalorder %s23_s9, %s539_s12  ;;  %p545_p7 = scmp.lt.s32.totalorder %s539_s12, %s539_s12 }
  0x14   :  { %p546_p8 = por %p545_p7, %p544_p6 }
  0x16   :  { %p547_p9 = pnand %p546_p8, %p540_p5 }
  0x18   :  { %550 = shalt.err (!%p547_p9)
}
  0x19   :  { %25 = dma.hbm_to_vmem [thread:$0]  %s725_s0, 64, %s23_s9, [#allocation3]  }
  0x1a   :  { %s559_s15 = scalar_lea.vmem %s46_s11, 1024  ;;  %p564_p11 = scmp.lt.s32.totalorder %s46_s11, %s46_s11 }
  0x1b   :  { %p560_p10 = scmp.ne.s32.totalorder %s46_s11, %s559_s15  ;;  %p565_p12 = scmp.lt.s32.totalorder %s559_s15, %s559_s15 }
  0x1d   :  { %p566_p13 = por %p565_p12, %p564_p11 }
  0x1f   :  { %p567_p0 = pnand %p566_p13, %p560_p10 }
  0x21   :  { %570 = shalt.err (!%p567_p0)
}
  0x22   :  { %51 = dma.hbm_to_vmem [thread:$0]  %s728_s3, 1024, %s46_s11, [#allocation6], %s620_s27, %s620_s27, %s621_s28  }
  0x23   :  { %s624_s17 = smov [#allocation8]  }
  0x24   :  { %s59_s18 = sshll.u32 %s624_s17, 4  ;;  %s60_s18 = int_to_ptr.vmem [resolvable:$true] %s59_s18 }
  0x25   :  { %s579_s19 = scalar_lea.vmem %s60_s18, 1024  ;;  %p584_p2 = scmp.lt.s32.totalorder %s60_s18, %s60_s18 }
  0x26   :  { %p580_p1 = scmp.ne.s32.totalorder %s60_s18, %s579_s19  ;;  %p585_p3 = scmp.lt.s32.totalorder %s579_s19, %s579_s19 }
  0x28   :  { %p586_p4 = por %p585_p3, %p584_p2 }
  0x2a   :  { %p587_p5 = pnand %p586_p4, %p580_p1 }
  0x2c   :  { %590 = shalt.err (!%p587_p5)
}
  0x2d   :  { %65 = dma.hbm_to_vmem [thread:$0]  %s730_s5, 1024, %s60_s18, [#allocation9], %s620_s27, %s620_s27, %s621_s28  }
  0x2e   :  { %611 = dma.done.wait [#allocation3], 64  }
  0x2f   :  { %612 = vsyncadd [#allocation3], 4294967232 }
  0x30   :  { %613 = dma.done.wait [#allocation6], 1280  }
  0x31   :  { %614 = vsyncadd [#allocation6], 4294966016 }
  0x32   :  { %615 = dma.done.wait [#allocation9], 1024  }
  0x33   :  { %616 = vsyncadd [#allocation9], 4294966272  ;;  %v625_v0 = vmov 0.0   ;;  %vm626_vm0 = vmmov 0   ;;  %v493_v1 = vld [vmem:[#allocation5 + $0x8] sm:$0xff]   ;;  %v494_v2 = vld [vmem:[#allocation5] sm:$0xff]  }
  0x34   :  { %436 = vmatprep.subr.bf16.mxu0 %v625_v0  ;;  %440 = vmatprep.mubr.msk.bf16.mxu0 %vm626_vm0, %v625_v0  ;;  %v495_v3 = vld [vmem:[#allocation7 + $0x38] sm:$0xff]   ;;  %vm105_vm1 = vcmask 261120   ;;  %v496_v4 = vld [vmem:[#allocation7 + $0x30] sm:$0xff]   ;;  %v81_v5 = vld [vmem:[#allocation2] sm:$0xf]  ;;  %s627_s24 = smov [#allocation10]  }
  0x35   :  { %444 = vmatprep.subr.bf16.mxu1 %v625_v0  ;;  %460 = vmatprep.mubr.msk.bf16.mxu1 %vm626_vm0, %v625_v0  ;;  %v497_v6 = vld [vmem:[#allocation7 + $0x28] sm:$0xff]   ;;  %v498_v7 = vld [vmem:[#allocation7 + $0x20] sm:$0xff]   ;;  %v499_v8 = vld [vmem:[#allocation7 + $0x18] sm:$0xff]   ;;  %s382_s25 = sshll.u32 %s627_s24, 4  ;;  %s383_s25 = int_to_ptr.vmem [resolvable:$true] %s382_s25 }
  0x36   :  { %437 = vmatpush3.bf16.msra.mxu0 %v493_v1  ;;  %445 = vmatpush3.bf16.msra.mxu1 %v495_v3  ;;  %v500_v9 = vld [vmem:[#allocation7 + $0x10] sm:$0xff]   ;;  %v501_v10 = vld [vmem:[#allocation7 + $0x8] sm:$0xff]   ;;  %v502_v11 = vld [vmem:[#allocation7] sm:$0xff]   ;;  %p596_p7 = scmp.lt.s32.totalorder %s383_s25, %s383_s25 }
  0x37   :  { %438 = vmatprep.subr.bf16.mxu0 %v625_v0  ;;  %446 = vmatprep.subr.bf16.mxu1 %v625_v0  ;;  %v503_v12 = vld [vmem:[#allocation8 + $0x38] sm:$0xff]   ;;  %v504_v13 = vld [vmem:[#allocation8 + $0x30] sm:$0xff]   ;;  %v505_v14 = vld [vmem:[#allocation8 + $0x28] sm:$0xff]  }
  0x38   :  { %v506_v15 = vld [vmem:[#allocation8 + $0x20] sm:$0xff]   ;;  %v507_v16 = vld [vmem:[#allocation8 + $0x18] sm:$0xff]   ;;  %v508_v17 = vld [vmem:[#allocation8 + $0x10] sm:$0xff]  }
  0x39   :  { %v393_v18 = vld [vmem:[%s727_s2] ss:$0 sm:$0xff]  ;;  %v510_v27 = vld [vmem:[#allocation8] sm:$0xff]  }
  0x3a   :  { %439 = vmatpush3.bf16.msra.mxu0 %v494_v2  ;;  %447 = vmatpush3.bf16.msra.mxu1 %v496_v4  ;;  %v509_v26 = vld [vmem:[#allocation8 + $0x8] sm:$0xff]  }
  0x3b   :  { %464 = vmatprep.subr.bf16.mxu0 %v625_v0  ;;  %448 = vmatprep.subr.bf16.mxu1 %v625_v0  ;;  %v397_v28 = vld [vmem:[%s729_s4] ss:$0 sm:$0xff]  ;;  %s591_s4 = scalar_lea.vmem %s383_s25, 128 }
  0x3c   :  { %v406_v36 = vld [vmem:[%s731_s6] ss:$0 sm:$0xff]  ;;  %p592_p6 = scmp.ne.s32.totalorder %s383_s25, %s591_s4  ;;  %p597_p8 = scmp.lt.s32.totalorder %s591_s4, %s591_s4 }
  0x3d   :  { %441 = vmatmul.mubr.msk.bf16.vlgmr.msra.gmra.mxu0 %vm105_vm1, %v81_v5 }
  0x3e   :  { %480 = vmatprep.mubr.msk.bf16.mxu0 %vm626_vm0, %v625_v0  ;;  %449 = vmatpush3.bf16.msra.mxu1 %v497_v6  ;;  %p598_p9 = por %p597_p8, %p596_p7 }
  0x3f   :  { %450 = vmatprep.subr.bf16.mxu1 %v625_v0  ;;  %465 = vmatpush3.bf16.msra.mxu0 %v503_v12 }
  0x40   :  { %466 = vmatprep.subr.bf16.mxu0 %v625_v0  ;;  %p599_p10 = pnand %p598_p9, %p592_p6 }
  0x42   :  { %451 = vmatpush3.bf16.msra.mxu1 %v498_v7 }
  0x43   :  { %452 = vmatprep.subr.bf16.mxu1 %v625_v0  ;;  %467 = vmatpush3.bf16.msra.mxu0 %v504_v13 }
  0x44   :  { %468 = vmatprep.subr.bf16.mxu0 %v625_v0 }
  0x46   :  { %453 = vmatpush3.bf16.msra.mxu1 %v499_v8 }
  0x47   :  { %454 = vmatprep.subr.bf16.mxu1 %v625_v0  ;;  %469 = vmatpush3.bf16.msra.mxu0 %v505_v14 }
  0x48   :  { %470 = vmatprep.subr.bf16.mxu0 %v625_v0 }
  0x4a   :  { %455 = vmatpush3.bf16.msra.mxu1 %v500_v9 }
  0x4b   :  { %456 = vmatprep.subr.bf16.mxu1 %v625_v0  ;;  %471 = vmatpush3.bf16.msra.mxu0 %v506_v15 }
  0x4c   :  { %472 = vmatprep.subr.bf16.mxu0 %v625_v0 }
  0x4e   :  { %457 = vmatpush3.bf16.msra.mxu1 %v501_v10 }
  0x4f   :  { %458 = vmatprep.subr.bf16.mxu1 %v625_v0  ;;  %473 = vmatpush3.bf16.msra.mxu0 %v507_v16 }
  0x50   :  { %474 = vmatprep.subr.bf16.mxu0 %v625_v0 }
  0x52   :  { %459 = vmatpush3.bf16.msra.mxu1 %v502_v11 }
  0x53   :  { %475 = vmatpush3.bf16.msra.mxu0 %v508_v17 }
  0x54   :  { %476 = vmatprep.subr.bf16.mxu0 %v625_v0 }
  0x57   :  { %477 = vmatpush3.bf16.msra.mxu0 %v509_v26 }
  0x58   :  { %478 = vmatprep.subr.bf16.mxu0 %v625_v0 }
  0x5b   :  { %479 = vmatpush3.bf16.msra.mxu0 %v510_v27 }
  0xfd   :  { %v143_v19 = vpop.f32.mrf.mxu0 }
  0xfe   :  { %v144_v20 = vadd.f32 %v393_v18, %v143_v19 }
  0xff   :  { %v442_v21 = vpop.f32.mrf.mxu0 }
 0x100   :  { %v149_v22 = vmax.f32 %v144_v20, 0.0 }
 0x101   :  { %v146_v23 = vpop.f32.mrf.mxu0 }
 0x102   :  { %v150_v24 = vpack.c.bf16 %v149_v22, %v149_v22 }
 0x103   :  { %v443_v25 = vpop.f32.mrf.mxu0 }
 0x104   :  { %461 = vmatmul.mubr.bf16.vlgmr.msra.gmra.mxu1 %v150_v24 }
 0x1c4   :  { %v256_v29 = vpop.f32.mrf.mxu1 }
 0x1c5   :  { %v257_v30 = vadd.f32 %v397_v28, %v256_v29 }
 0x1c6   :  { %v462_v31 = vpop.f32.mrf.mxu1 }
 0x1c7   :  { %v262_v32 = vmax.f32 %v257_v30, 0.0 }
 0x1c8   :  { %v259_v33 = vpop.f32.mrf.mxu1 }
 0x1c9   :  { %v263_v34 = vpack.c.bf16 %v262_v32, %v262_v32 }
 0x1ca   :  { %v463_v35 = vpop.f32.mrf.mxu1 }
 0x1cb   :  { %481 = vmatmul.mubr.bf16.vlgmr.msra.gmra.mxu0 %v263_v34 }
 0x28b   :  { %v369_v37 = vpop.f32.mrf.mxu0 }
 0x28c   :  { %v370_v38 = vadd.f32 %v406_v36, %v369_v37 }
 0x28d   :  { %v482_v39 = vpop.f32.mrf.mxu0 }
 0x28e   :  { %375 = vst [vmem:[#allocation10] sm:$0xff] %v370_v38 }
 0x28f   :  { %v372_v40 = vpop.f32.mrf.mxu0 }
 0x290   :  { %602 = shalt.err (!%p599_p10)
}
 0x291   :  { %385 = dma.vmem_to_hbm [thread:$0]  %s383_s25, 128, %s732_s7, [#allocation4]   ;;  %v483_v41 = vpop.f32.mrf.mxu0 }
 0x292   :  { %617 = dma.done.wait [#allocation4], 128  }
 0x293   :  { %618 = vsyncadd [#allocation4], 4294967168 }
 0x294   :  { %389 = vsyncpa [#allocation3], 1 }
 0x295   :  { %390 = vsyncpa [#allocation6], 1 }
 0x296   :  { %391 = vsyncpa [#allocation9], 1 }
 0x297   :  { %392 = vsyncpa [#allocation4], 1 }

</bundles_post_ra>
